<compile_context>
chip_gen: v7x
topology: tpu7x:2x2x1
jax: 0.10.0
libtpu: 0.0.40
codegen_flags: <defaults>
</compile_context>

<pallas_src>
import jax
import jax.numpy as jnp
import numpy as np
from jax.experimental import pallas as pl
from jax.experimental.pallas import tpu as pltpu


def _round_up(x, m):
    return (x + m - 1) // m * m


def _conv_matmul_kernel(w_ref, p_ref, b_ref, o_ref):
    """Pure matmul + bias for one (batch, M-tile) block.

    w_ref : (Cout, K_pad)        bf16  weight with all taps folded into K
    p_ref : (1, K_pad, M_tile)   bf16  im2col patches (lane-dense on M)
    b_ref : (Cout, 1)            f32   bias
    o_ref : (1, Cout, M_tile)    f32   output, lane-dense on M (NCHW-flat)
    """
    acc = jnp.dot(w_ref[...], p_ref[0], preferred_element_type=jnp.float32)
    o_ref[0] = (acc + b_ref[...]).astype(o_ref.dtype)


def my_convo2d(x_nchw, weight_oihw, bias=None, *, m_tile_max=2048):
    """Pallas forward of MyConvo2d: stride-1 conv, padding=(kernel_size-1)//2."""
    B, Cin, H, W = x_nchw.shape
    Cout, Cin_w, KH, KW = weight_oihw.shape
    assert Cin_w == Cin
    assert KH == KW, "MyConvo2d only builds square kernels (single kernel_size)"
    pad = (KH - 1) // 2
    H_out = H + 2 * pad - KH + 1
    W_out = W + 2 * pad - KW + 1
    HW = H_out * W_out
    K = Cin * KH * KW
    K_pad = _round_up(K, 128)

    # Wrapper-side im2col (XLA): (B, Cin*KH*KW, H_out, W_out).  The channel
    # ordering is cin-major then (kh, kw) — identical to weight.reshape(Cout,-1).
    patches = jax.lax.conv_general_dilated_patches(
        x_nchw.astype(jnp.bfloat16),
        filter_shape=(KH, KW),
        window_strides=(1, 1),
        padding=[(pad, pad), (pad, pad)],
        dimension_numbers=("NCHW", "OIHW", "NCHW"),
    ).reshape(B, K, HW)

    # M tile: lane-dense (multiple of 128), capped so one bf16 patch block
    # stays <= ~4 MiB (VMEM-safe on v7x even with double buffering).
    m_cap = max(128, (4 * 1024 * 1024 // (K_pad * 2)) // 128 * 128)
    M_TILE = min(_round_up(HW, 128), m_tile_max, m_cap)
    HW_pad = _round_up(HW, M_TILE)
    n_m = HW_pad // M_TILE

    patches = jnp.pad(patches, ((0, 0), (0, K_pad - K), (0, HW_pad - HW)))

    # Weight (Cout, Cin, KH, KW) -> (Cout, K_pad); zero-pad K (no-op in matmul).
    w = weight_oihw.reshape(Cout, K).astype(jnp.bfloat16)
    w = jnp.pad(w, ((0, 0), (0, K_pad - K)))

    if bias is None:
        b = jnp.zeros((Cout, 1), jnp.float32)
    else:
        b = bias.reshape(Cout, 1).astype(jnp.float32)

    cost = pl.CostEstimate(
        flops=2 * B * HW_pad * K_pad * Cout,
        transcendentals=0,
        bytes_accessed=(B * K_pad * HW_pad * 2 + Cout * K_pad * 2
                        + Cout * 4 + B * Cout * HW_pad * 4),
    )

    out_flat = pl.pallas_call(
        _conv_matmul_kernel,
        out_shape=jax.ShapeDtypeStruct((B, Cout, HW_pad), jnp.float32),
        grid=(B, n_m),
        in_specs=[
            pl.BlockSpec((Cout, K_pad), lambda bi, mi: (0, 0)),      # resident
            pl.BlockSpec((1, K_pad, M_TILE), lambda bi, mi: (bi, 0, mi)),
            pl.BlockSpec((Cout, 1), lambda bi, mi: (0, 0)),          # resident
        ],
        out_specs=pl.BlockSpec((1, Cout, M_TILE), lambda bi, mi: (bi, 0, mi)),
        compiler_params=pltpu.CompilerParams(
            dimension_semantics=("parallel", "parallel")),
        cost_estimate=cost,
    )(w, patches, b)

    # Free: data is already in NCHW order; drop M padding and reshape.
    return out_flat[:, :, :HW].reshape(B, Cout, H_out, W_out)


if __name__ == "__main__":
    key = jax.random.PRNGKey(0)
    kx, kw, kb = jax.random.split(key, 3)
    B, Cin, H, W = 2, 4, 16, 16          # small shapes consistent with the module
    Cout, Ksz = 32, 5
    pad = (Ksz - 1) // 2

    x = jax.random.normal(kx, (B, Cin, H, W), jnp.float32)
    weight = jax.random.normal(kw, (Cout, Cin, Ksz, Ksz), jnp.float32) * 0.05
    bias = jax.random.normal(kb, (Cout,), jnp.float32) * 0.1

    out = jax.jit(my_convo2d)(x, weight, bias)
    out = jax.block_until_ready(out)
    assert out.shape == (B, Cout, H, W) and out.dtype == jnp.float32

    # Reference: XLA convolution with identical semantics (PyTorch-style
    # cross-correlation, same padding, stride 1, plus bias), f32.
    ref = jax.lax.conv_general_dilated(
        x, weight, window_strides=(1, 1), padding=[(pad, pad), (pad, pad)],
        dimension_numbers=("NCHW", "OIHW", "NCHW"),
    ) + bias[None, :, None, None]
    np.testing.assert_allclose(np.asarray(out), np.asarray(ref), atol=2e-2, rtol=2e-2)

    print("KERNEL_OK")
</pallas_src>

<mosaic_0001>
module attributes {stable_mosaic.version = 11 : i64} {
  func.func @_conv_matmul_kernel(%arg0: i32, %arg1: i32, %arg2: memref<32x128xbf16, #tpu.memory_space<vmem>>, %arg3: memref<1x128x256xbf16, #tpu.memory_space<vmem>>, %arg4: memref<32x1xf32, #tpu.memory_space<vmem>>, %arg5: memref<1x32x256xf32, #tpu.memory_space<vmem>>) attributes {dimension_semantics = [#tpu.dimension_semantics<parallel>, #tpu.dimension_semantics<parallel>], iteration_bounds = array<i64: 2, 1>, scalar_prefetch = 0 : i64, scratch_operands = 0 : i64, tpu.core_type = #tpu.core_type<tc>, window_params = [{pipeline_mode = #tpu.pipeline_mode<synchronous>, transform_indices = @transform_0, window_bounds = array<i64: 32, 128>}, {transform_indices = @transform_1, window_bounds = array<i64: 1, 128, 256>}, {pipeline_mode = #tpu.pipeline_mode<synchronous>, transform_indices = @transform_2, window_bounds = array<i64: 32, 1>}, {transform_indices = @transform_3, window_bounds = array<i64: 1, 32, 256>}]} {
    %c0 = arith.constant 0 : index
    %c0_0 = arith.constant 0 : index
    %0 = vector.load %arg2[%c0, %c0_0] : memref<32x128xbf16, #tpu.memory_space<vmem>>, vector<32x128xbf16>
    %c0_1 = arith.constant 0 : index
    %c0_2 = arith.constant 0 : index
    %c0_3 = arith.constant 0 : index
    %1 = vector.load %arg3[%c0_1, %c0_2, %c0_3] : memref<1x128x256xbf16, #tpu.memory_space<vmem>>, vector<1x128x256xbf16>
    %2 = vector.shape_cast %1 : vector<1x128x256xbf16> to vector<128x256xbf16>
    %cst = arith.constant dense<0.000000e+00> : vector<32x256xf32>
    %3 = tpu.matmul %0, %2, %cst {dimension_numbers = #tpu.dot_dimension_numbers<[1], [0], [0], [1], [0, 0, 1, 1], [], []>} : vector<32x128xbf16>, vector<128x256xbf16>, vector<32x256xf32> -> vector<32x256xf32>
    %c0_4 = arith.constant 0 : index
    %c0_5 = arith.constant 0 : index
    %4 = vector.load %arg4[%c0_4, %c0_5] : memref<32x1xf32, #tpu.memory_space<vmem>>, vector<32x1xf32>
    %5 = vector.broadcast %4 : vector<32x1xf32> to vector<32x256xf32>
    %6 = arith.addf %3, %5 : vector<32x256xf32>
    %c0_6 = arith.constant 0 : index
    %c0_7 = arith.constant 0 : index
    %c0_8 = arith.constant 0 : index
    %7 = vector.load %arg5[%c0_6, %c0_7, %c0_8] : memref<1x32x256xf32, #tpu.memory_space<vmem>>, vector<1x32x256xf32>
    %8 = vector.shape_cast %7 : vector<1x32x256xf32> to vector<32x256xf32>
    %9 = vector.shape_cast %6 : vector<32x256xf32> to vector<1x32x256xf32>
    tpu.vector_store %arg5[%c0_6, %c0_7, %c0_8], %9 {strides = array<i32>} : memref<1x32x256xf32, #tpu.memory_space<vmem>>, vector<1x32x256xf32>,
    return
  }
  func.func @transform_0(%arg0: i32, %arg1: i32) -> (i32, i32) {
    %c0_i32 = arith.constant 0 : i32
    %c0_i32_0 = arith.constant 0 : i32
    %c0_i32_1 = arith.constant 0 : i32
    return %c0_i32, %c0_i32_0 : i32, i32
  }
  func.func @transform_1(%arg0: i32, %arg1: i32) -> (i32, i32, i32) {
    %c0_i32 = arith.constant 0 : i32
    %c0_i32_0 = arith.constant 0 : i32
    return %arg0, %c0_i32, %arg1 : i32, i32, i32
  }
  func.func @transform_2(%arg0: i32, %arg1: i32) -> (i32, i32) {
    %c0_i32 = arith.constant 0 : i32
    %c0_i32_0 = arith.constant 0 : i32
    %c0_i32_1 = arith.constant 0 : i32
    return %c0_i32, %c0_i32_0 : i32, i32
  }
  func.func @transform_3(%arg0: i32, %arg1: i32) -> (i32, i32, i32) {
    %c0_i32 = arith.constant 0 : i32
    %c0_i32_0 = arith.constant 0 : i32
    return %arg0, %c0_i32, %arg1 : i32, i32, i32
  }
}

</mosaic_0001>

<bundles_post_ra>
// kernel: my_convo2d.1
= control target key start
LH: loop header
LB: loop body
LE: loop exit
PB: predicated region body
PF: predicated region fallthrough
CT: control target
= control target key end

     0   :  { %s640_s12 = smov 0   ;;  %s642_s13 = smov 0   ;;  %s713_s0 = inlined_call_operand.vmem [shape: bf16[32,128], index: 0, kind: input, shape index: {}]   ;;  %s714_s1 = inlined_call_operand.vmem [shape: bf16[2,128,256], index: 1, kind: input, shape index: {}]   ;;  %s715_s2 = inlined_call_operand.vmem [shape: f32[32,1], index: 2, kind: input, shape index: {}]   ;;  %s716_s3 = inlined_call_operand.vmem [shape: f32[2,32,256], index: 3, kind: output, shape index: {}]  }
   0x1   :  { %s644_s14 = smov 0  }
   0x2 LB: > { %s25_s15 = sadd.s32 1, %s613_s13  ;;  %p499_p0 = scmp.ge.s32.totalorder %s617_s14, 1  ;;  %s617_s14 = sphi %s644_s14, %s13_s14   ;;  %s613_s13 = sphi %s642_s13, %s718_s13   ;;  %s609_s12 = sphi %s640_s12, %s717_s12  }
   0x3   : > { %p27_p1 = scmp.ge.s32.totalorder %s25_s15, 2  ;;  %p158_p2 = scmp.lt.s32.totalorder %s617_s14, 3 }
   0x5   : > { %s720_s15 = smov (%p27_p1, %s25_s15), 0  ;;  %p159_p3 = pnand %p499_p0, %p158_p2 }
   0x6   : > { %p191_p4 = scmp.lt.s32.totalorder (!%p159_p3), %s609_s12, 1  ;;  %v619_v0 = vmov (!%p159_p3), 0   ;;  %v233_v1 = vld [vmem:[%s715_s2 + $0x10] sm:$0xff] (!%p159_p3)  ;;  %v231_v2 = vld [vmem:[%s715_s2] sm:$0xff] (!%p159_p3)  ;;  %v234_v3 = vld [vmem:[%s715_s2 + $0x18] sm:$0xff] (!%p159_p3) }
   0x7   : > { %162 = sbr.rel (%p159_p3) target bundleno = 268 (0x10c), region = 32  ;;  %379 = vmatprep.mubr.bf16.mxu0 (!%p159_p3), %v619_v0  ;;  %389 = vmatprep.mubr.bf16.mxu1 (!%p159_p3), %v619_v0  ;;  %v232_v4 = vld [vmem:[%s715_s2 + $0x8] sm:$0xff] (!%p159_p3)  ;;  %v593_v21 = vld [vmem:[%s713_s0] sm:$0xff] (!%p159_p3)  }
   0x8   : > { %568 = vset.pattern.permute.xlu1 (!%p159_p3), %v619_v0  ;;  %567 = vset.pattern.permute.xlu0 (!%p159_p3), %v619_v0  ;;  %v594_v22 = vld [vmem:[%s713_s0 + $0x8] sm:$0xff] (!%p159_p3)  }
   0x9   : > { %247 = vperm.xlu1 (!%p159_p3), %568, %v233_v1   ;;  %237 = vperm.xlu0 (!%p159_p3), %567, %v231_v2  }
   0xd   : > { %252 = vperm.xlu1 (!%p159_p3), %568, %v234_v3   ;;  %242 = vperm.xlu0 (!%p159_p3), %567, %v232_v4  }
   0xe   : > { %s722_s12 = smov (!%p191_p4, %s609_s12), 1 }
   0xf   : > { %s524_s20 = sshll.u32 %s722_s12, 7  ;;  %s525_s5 = sshll.u32 %s722_s12, 6 }
  0x10   : > { %s676_s27 = scalar_lea.vmem %s714_s1, %s524_s20  ;;  %s208_s8 = scalar_lea.vmem %s716_s3, %s525_s5 }
  0x11   : > { %v569_v5 = vld [vmem:[%s676_s27 + $0x4] ss:$8 sps:$4 sm:$0xff]   ;;  %v571_v6 = vld [vmem:[%s676_s27] ss:$8 sps:$4 sm:$0xff]   ;;  %v572_v7 = vld [vmem:[%s676_s27 + $0x14] ss:$8 sps:$4 sm:$0xff]  }
  0x12   : > { %347 = vmatprep.subr.bf16.mxu0 %v569_v5  ;;  %526 = vmatprep.subr.bf16.mxu1 %v569_v5  ;;  %v574_v8 = vld [vmem:[%s676_s27 + $0x10] ss:$8 sps:$4 sm:$0xff]   ;;  %v575_v9 = vld [vmem:[%s676_s27 + $0x24] ss:$8 sps:$4 sm:$0xff]   ;;  %v577_v10 = vld [vmem:[%s676_s27 + $0x20] ss:$8 sps:$4 sm:$0xff]  }
  0x13   : > { %348 = vmatpush1.bf16.msra.mxu0 %v571_v6  ;;  %534 = vmatpush1.bf16.msra.mxu1 %v571_v6  ;;  %v578_v11 = vld [vmem:[%s676_s27 + $0x34] ss:$8 sps:$4 sm:$0xff]   ;;  %v580_v12 = vld [vmem:[%s676_s27 + $0x30] ss:$8 sps:$4 sm:$0xff]   ;;  %v581_v13 = vld [vmem:[%s676_s27 + $0x44] ss:$8 sps:$4 sm:$0xff]  }
  0x14   : > { %349 = vmatprep.subr.bf16.mxu0 %v572_v7  ;;  %527 = vmatprep.subr.bf16.mxu1 %v572_v7  ;;  %v583_v14 = vld [vmem:[%s676_s27 + $0x40] ss:$8 sps:$4 sm:$0xff]   ;;  %v584_v15 = vld [vmem:[%s676_s27 + $0x54] ss:$8 sps:$4 sm:$0xff]   ;;  %v586_v16 = vld [vmem:[%s676_s27 + $0x50] ss:$8 sps:$4 sm:$0xff]  }
  0x15   : > { %v587_v17 = vld [vmem:[%s676_s27 + $0x64] ss:$8 sps:$4 sm:$0xff]   ;;  %v589_v18 = vld [vmem:[%s676_s27 + $0x60] ss:$8 sps:$4 sm:$0xff]   ;;  %v590_v19 = vld [vmem:[%s676_s27 + $0x74] ss:$8 sps:$4 sm:$0xff]  }
  0x16   : > { %v592_v20 = vld [vmem:[%s676_s27 + $0x70] ss:$8 sps:$4 sm:$0xff]  }
  0x17   : > { %350 = vmatpush1.bf16.msra.mxu0 %v574_v8  ;;  %535 = vmatpush1.bf16.msra.mxu1 %v574_v8 }
  0x18   : > { %351 = vmatprep.subr.bf16.mxu0 %v575_v9  ;;  %528 = vmatprep.subr.bf16.mxu1 %v575_v9 }
  0x1b   : > { %352 = vmatpush1.bf16.msra.mxu0 %v577_v10  ;;  %536 = vmatpush1.bf16.msra.mxu1 %v577_v10 }
  0x1c   : > { %353 = vmatprep.subr.bf16.mxu0 %v578_v11  ;;  %529 = vmatprep.subr.bf16.mxu1 %v578_v11 }
  0x1f   : > { %354 = vmatpush1.bf16.msra.mxu0 %v580_v12  ;;  %537 = vmatpush1.bf16.msra.mxu1 %v580_v12 }
  0x20   : > { %355 = vmatprep.subr.bf16.mxu0 %v581_v13  ;;  %530 = vmatprep.subr.bf16.mxu1 %v581_v13 }
  0x23   : > { %356 = vmatpush1.bf16.msra.mxu0 %v583_v14  ;;  %538 = vmatpush1.bf16.msra.mxu1 %v583_v14 }
  0x24   : > { %357 = vmatprep.subr.bf16.mxu0 %v584_v15  ;;  %531 = vmatprep.subr.bf16.mxu1 %v584_v15 }
  0x27   : > { %358 = vmatpush1.bf16.msra.mxu0 %v586_v16  ;;  %539 = vmatpush1.bf16.msra.mxu1 %v586_v16 }
  0x28   : > { %359 = vmatprep.subr.bf16.mxu0 %v587_v17  ;;  %532 = vmatprep.subr.bf16.mxu1 %v587_v17 }
  0x2b   : > { %360 = vmatpush1.bf16.msra.mxu0 %v589_v18  ;;  %540 = vmatpush1.bf16.msra.mxu1 %v589_v18 }
  0x2c   : > { %361 = vmatprep.subr.bf16.mxu0 %v590_v19  ;;  %533 = vmatprep.subr.bf16.mxu1 %v590_v19 }
  0x2f   : > { %362 = vmatpush1.bf16.msra.mxu0 %v592_v20  ;;  %541 = vmatpush1.bf16.msra.mxu1 %v592_v20 }
  0x32   : > { %380 = vmatmul.mubr.bf16.vlgmr.msra.gmra.mrb[0].mxu0 %v593_v21  ;;  %390 = vmatmul.mubr.bf16.vlgmr.msra.gmra.mrb[0].mxu1 %v594_v22 }
  0x88   : > { %v248_v23 = vpop.permute.xlu1 %247  ;;  %v238_v24 = vpop.permute.xlu0 %237 }
  0x8c   : > { %v253_v25 = vpop.permute.xlu1 %252  ;;  %v243_v26 = vpop.permute.xlu0 %242 }
 0x105   : > { %v381_v27 = vpop.f32.mrb[0].mxu0  ;;  %v391_v28 = vpop.f32.mrb[0].mxu1 }
 0x106   : > { %v382_v29 = vadd.f32 %v381_v27, %v238_v24  ;;  %v392_v30 = vadd.f32 %v391_v28, %v248_v23  ;;  %v383_v31 = vpop.f32.mrb[1].mxu0  ;;  %v393_v32 = vpop.f32.mrb[1].mxu1 }
 0x107   : > { %v384_v33 = vadd.f32 %v383_v31, %v238_v24  ;;  %v394_v34 = vadd.f32 %v393_v32, %v248_v23  ;;  %v385_v35 = vpop.f32.mrb[2].mxu0  ;;  %v395_v36 = vpop.f32.mrb[2].mxu1 }
 0x108   : > { %400 = vst [vmem:[%s208_s8] sm:$0xff] %v382_v29  ;;  %404 = vst [vmem:[%s208_s8 + $0x20] sm:$0xff] %v392_v30  ;;  %v386_v37 = vadd.f32 %v385_v35, %v243_v26  ;;  %v396_v38 = vadd.f32 %v395_v36, %v253_v25  ;;  %v387_v39 = vpop.f32.mrb[3].mxu0  ;;  %v397_v40 = vpop.f32.mrb[3].mxu1 }
 0x109   : > { %401 = vst [vmem:[%s208_s8 + $0x8] sm:$0xff] %v384_v33  ;;  %405 = vst [vmem:[%s208_s8 + $0x28] sm:$0xff] %v394_v34  ;;  %v388_v41 = vadd.f32 %v387_v39, %v243_v26  ;;  %v398_v42 = vadd.f32 %v397_v40, %v253_v25 }
 0x10a   : > { %402 = vst [vmem:[%s208_s8 + $0x10] sm:$0xff] %v386_v37  ;;  %406 = vst [vmem:[%s208_s8 + $0x30] sm:$0xff] %v396_v38 }
 0x10b   : > { %403 = vst [vmem:[%s208_s8 + $0x18] sm:$0xff] %v388_v41  ;;  %407 = vst [vmem:[%s208_s8 + $0x38] sm:$0xff] %v398_v42 }
 0x10c PF: > { %s13_s14 = sadd.s32 1, %s617_s14   ;;  %s717_s12 = smov %s613_s13 }
 0x10d   : > { %p10_p5 = scmp.ge.s32.totalorder %s13_s14, 4   ;;  %s718_s13 = smov %s720_s15 }
 0x10f   :  { %12 = sbr.rel (!%p10_p5) target bundleno = 2 (0x2), region = 62 }

</bundles_post_ra>
